<compile_context>
chip_gen: v6e
topology: v6e:2x2x1
jax: 0.10.0
libtpu: 0.0.40
codegen_flags: <defaults>
</compile_context>

<pallas_src>
import numpy as np
import jax
import jax.numpy as jnp
from jax.experimental import pallas as pl
from jax.experimental.pallas import tpu as pltpu

LANES = 128


def _normal_density_kernel(const_ref, x_ref, sel_ref, out_ref):
    # const_ref: SMEM [1]          -> precomputed constant term
    # x_ref:     VMEM [TILE, 128]  -> lane-dense slab of noise values
    # sel_ref:   VMEM [128, G]     -> weighted group selector (resident)
    # out_ref:   VMEM [TILE, G]    -> per-agent log prior (G agents per row)
    x = x_ref[...]
    sq = x * x
    out_ref[...] = const_ref[0] - jnp.dot(
        sq,
        sel_ref[...],
        preferred_element_type=jnp.float32,
        precision=jax.lax.Precision.HIGHEST,
    )


def compute_normal_density(noise, std_pos=1.0, std_vel=1.0, *, tile_rows=4096):
    """Pallas equivalent of the PyTorch module's forward.

    noise:   [B, N, D] (first 2 features = position, rest = velocity)
    returns: [B, N]    float32 log prior
    """
    B, N, D = noise.shape
    assert D >= 2, "first two feature channels must be position"

    if noise.dtype != jnp.float32:
        noise = noise.astype(jnp.float32)

    # --- make the feature dim a divisor of 128 (zero-pad if necessary) ------
    if LANES % D != 0:
        D_pad = int(pl.next_power_of_2(D))
        if D_pad > LANES:
            # TODO(synk): feature dims with next_pow2(D) > 128 would need a
            # multi-row-per-agent reduction; not needed for this module.
            raise NotImplementedError("D too large for single-row agent layout")
        noise = jnp.pad(noise, ((0, 0), (0, 0), (0, D_pad - D)))
    else:
        D_pad = D
    G = LANES // D_pad            # agents packed per 128-lane row
    A = B * N                     # total number of agents

    # --- scalar math hoisted out of the kernel ------------------------------
    sp = jnp.asarray(std_pos, jnp.float32)
    sv = jnp.asarray(std_vel, jnp.float32)
    inv_2sp2 = 0.5 / (sp * sp)
    inv_2sv2 = 0.5 / (sv * sv)
    log_c = jnp.float32(-0.5 * np.log(2.0 * np.pi))
    const = (jnp.float32(D) * log_c
             - 2.0 * jnp.log(sp)
             - jnp.float32(D - 2) * jnp.log(sv))
    const_arr = jnp.reshape(const, (1,)).astype(jnp.float32)

    # weighted selector: sel[l, g] = weight(l % D_pad) if l // D_pad == g else 0
    lane = np.arange(LANES)
    group_onehot = jnp.asarray(
        (lane[:, None] // D_pad) == np.arange(G)[None, :], dtype=jnp.float32)
    feat = jnp.asarray(lane % D_pad)
    w_lane = jnp.where(feat < 2, inv_2sp2,
                       jnp.where(feat < D, inv_2sv2, jnp.float32(0.0)))
    sel = group_onehot * w_lane[:, None]          # [128, G] float32

    # --- lane-dense slab view of the input ----------------------------------
    L = A * D_pad
    flat = noise.reshape(L)
    R = pl.cdiv(L, LANES)
    if R * LANES != L:
        flat = jnp.pad(flat, (0, R * LANES - L))
    x2d = flat.reshape(R, LANES)

    TILE = min(tile_rows, R)
    if TILE != R:
        TILE = max(8, (TILE // 8) * 8)            # keep (8,128) block alignment
    grid = (pl.cdiv(R, TILE),)

    out2d = pl.pallas_call(
        _normal_density_kernel,
        out_shape=jax.ShapeDtypeStruct((R, G), jnp.float32),
        grid=grid,
        in_specs=[
            pl.BlockSpec(memory_space=pltpu.SMEM),              # const scalar
            pl.BlockSpec((TILE, LANES), lambda i: (i, 0)),       # noise slab tile
            pl.BlockSpec((LANES, G), lambda i: (0, 0)),          # selector (resident)
        ],
        out_specs=pl.BlockSpec((TILE, G), lambda i: (i, 0)),
        compiler_params=pltpu.CompilerParams(
            dimension_semantics=("parallel",),
            vmem_limit_bytes=32 * 1024 * 1024,
        ),
    )(const_arr, x2d, sel)

    # agent a lives at out2d[a // G, a % G]  ->  flatten restores agent order
    return out2d.reshape(-1)[:A].reshape(B, N)


def _reference(noise, std_pos=1.0, std_vel=1.0):
    # pure-JAX reference mirroring the PyTorch code
    log_c = -0.5 * jnp.log(2.0 * jnp.pi)
    D = noise.shape[-1]
    sp = jnp.asarray(std_pos, jnp.float32)
    sv = jnp.asarray(std_vel, jnp.float32)
    noise_pos = noise[:, :, :2]
    noise_vel = noise[:, :, 2:]
    return (D * log_c
            - 2.0 * jnp.log(sp)
            - jnp.sum(noise_pos ** 2 / (2.0 * sp ** 2), axis=-1)
            - (D - 2) * jnp.log(sv)
            - jnp.sum(noise_vel ** 2 / (2.0 * sv ** 2), axis=-1))


if __name__ == "__main__":
    key = jax.random.PRNGKey(0)

    # 1) small shape matching the module (2 pos + 2 vel features)
    B, N, D = 2, 8, 4
    noise = jax.random.normal(key, (B, N, D), dtype=jnp.float32)
    out = jax.block_until_ready(compute_normal_density(noise, 1.0, 1.0))
    ref = _reference(noise, 1.0, 1.0)
    np.testing.assert_allclose(np.asarray(out), np.asarray(ref), rtol=1e-4, atol=1e-4)

    # 2) multi-tile grid path (several pipelined grid steps)
    B2, N2, D2 = 4, 640, 4
    noise2 = jax.random.normal(jax.random.PRNGKey(0), (B2, N2, D2), dtype=jnp.float32)
    out2 = jax.block_until_ready(
        compute_normal_density(noise2, 0.7, 1.3, tile_rows=16))
    ref2 = _reference(noise2, 0.7, 1.3)
    np.testing.assert_allclose(np.asarray(out2), np.asarray(ref2), rtol=1e-4, atol=1e-4)

    # 3) feature dim that does not divide 128 (padded-feature path)
    B3, N3, D3 = 2, 8, 6
    noise3 = jax.random.normal(jax.random.PRNGKey(0), (B3, N3, D3), dtype=jnp.float32)
    out3 = jax.block_until_ready(compute_normal_density(noise3))
    ref3 = _reference(noise3)
    np.testing.assert_allclose(np.asarray(out3), np.asarray(ref3), rtol=1e-4, atol=1e-4)

    print("KERNEL_OK")
</pallas_src>

<mosaic_0001>
module attributes {stable_mosaic.version = 11 : i64} {
  func.func @_normal_density_kernel(%arg0: i32, %arg1: memref<1xf32, #tpu.memory_space<smem>>, %arg2: memref<1x128xf32, #tpu.memory_space<vmem>>, %arg3: memref<128x32xf32, #tpu.memory_space<vmem>>, %arg4: memref<1x32xf32, #tpu.memory_space<vmem>>) attributes {dimension_semantics = [#tpu.dimension_semantics<parallel>], iteration_bounds = array<i64: 1>, scalar_prefetch = 0 : i64, scratch_operands = 0 : i64, tpu.core_type = #tpu.core_type<tc>, window_params = [{transform_indices = @transform_0, window_bounds = array<i64: 1>}, {transform_indices = @transform_1, window_bounds = array<i64: 1, 128>}, {pipeline_mode = #tpu.pipeline_mode<synchronous>, transform_indices = @transform_2, window_bounds = array<i64: 128, 32>}, {transform_indices = @transform_3, window_bounds = array<i64: 1, 32>}]} {
    %c0 = arith.constant 0 : index
    %c0_0 = arith.constant 0 : index
    %0 = vector.load %arg2[%c0, %c0_0] : memref<1x128xf32, #tpu.memory_space<vmem>>, vector<1x128xf32>
    %1 = arith.mulf %0, %0 : vector<1x128xf32>
    %c0_1 = arith.constant 0 : index
    %2 = memref.load %arg1[%c0_1] : memref<1xf32, #tpu.memory_space<smem>>
    %c0_2 = arith.constant 0 : index
    %c0_3 = arith.constant 0 : index
    %3 = vector.load %arg3[%c0_2, %c0_3] : memref<128x32xf32, #tpu.memory_space<vmem>>, vector<128x32xf32>
    %cst = arith.constant dense<0.000000e+00> : vector<1x32xf32>
    %4 = tpu.matmul %1, %3, %cst {dimension_numbers = #tpu.dot_dimension_numbers<[1], [0], [0], [1], [0, 0, 1, 1], [], []>, precision = #tpu.contract_precision<fp32>} : vector<1x128xf32>, vector<128x32xf32>, vector<1x32xf32> -> vector<1x32xf32>
    %5 = vector.broadcast %2 : f32 to vector<1x32xf32>
    %6 = arith.subf %5, %4 : vector<1x32xf32>
    %c0_4 = arith.constant 0 : index
    %c0_5 = arith.constant 0 : index
    %7 = vector.load %arg4[%c0_4, %c0_5] : memref<1x32xf32, #tpu.memory_space<vmem>>, vector<1x32xf32>
    tpu.vector_store %arg4[%c0_4, %c0_5], %6 {strides = array<i32>} : memref<1x32xf32, #tpu.memory_space<vmem>>, vector<1x32xf32>,
    return
  }
  func.func @transform_0(%arg0: i32) -> i32 {
    %c0_i32 = arith.constant 0 : i32
    %c0_i32_0 = arith.constant 0 : i32
    return %c0_i32 : i32
  }
  func.func @transform_1(%arg0: i32) -> (i32, i32) {
    %c0_i32 = arith.constant 0 : i32
    %c0_i32_0 = arith.constant 0 : i32
    return %arg0, %c0_i32 : i32, i32
  }
  func.func @transform_2(%arg0: i32) -> (i32, i32) {
    %c0_i32 = arith.constant 0 : i32
    %c0_i32_0 = arith.constant 0 : i32
    %c0_i32_1 = arith.constant 0 : i32
    return %c0_i32, %c0_i32_0 : i32, i32
  }
  func.func @transform_3(%arg0: i32) -> (i32, i32) {
    %c0_i32 = arith.constant 0 : i32
    %c0_i32_0 = arith.constant 0 : i32
    return %arg0, %c0_i32 : i32, i32
  }
}

</mosaic_0001>

<bundles_post_ra>
// kernel: tpu_custom_call.1
= control target key start
LH: loop header
LB: loop body
LE: loop exit
PB: predicated region body
PF: predicated region fallthrough
CT: control target
= control target key end

     0   :  { %v1031_v3 = vmov 0.0   ;;  %vm1032_vm0 = vmmov 0   ;;  %s1474_s0 = inlined_call_operand.<no memory space> [shape: f32[1], index: 0, kind: input, shape index: {}]   ;;  %s1475_s1 = inlined_call_operand.vmem [shape: f32[1,128], index: 1, kind: input, shape index: {}]   ;;  %s1476_s2 = inlined_call_operand.vmem [shape: f32[128,32], index: 2, kind: input, shape index: {}]   ;;  %s1477_s3 = inlined_call_operand.hbm [shape: f32[1,32], index: 3, kind: output, shape index: {}]  }
   0x1   :  { %v34_v0 = vld [vmem:[%s1476_s2 + $0x78] sm:$0xff]  ;;  %v33_v1 = vld [vmem:[%s1476_s2 + $0x70] sm:$0xff]  ;;  %v32_v2 = vld [vmem:[%s1476_s2 + $0x68] sm:$0xff]  ;;  %796 = vmatprep.subr.mxu0 %v1031_v3  ;;  %831 = vmatprep.subr.mxu1 %v1031_v3 }
   0x2   :  { %v1064_v4 = vand.u32 4294901760, %v34_v0  ;;  %v1066_v5 = vand.u32 4294901760, %v33_v1  ;;  %v1068_v6 = vand.u32 4294901760, %v32_v2  ;;  %v31_v7 = vld [vmem:[%s1476_s2 + $0x60] sm:$0xff]  ;;  %v30_v8 = vld [vmem:[%s1476_s2 + $0x58] sm:$0xff]  ;;  %v29_v9 = vld [vmem:[%s1476_s2 + $0x50] sm:$0xff]  ;;  %828 = vmatprep.mubr.msk.f32.mxu0 %vm1032_vm0, %v1031_v3  ;;  %863 = vmatprep.mubr.msk.f32.mxu1 %vm1032_vm0, %v1031_v3 }
   0x3   :  { %v1080_v10 = vand.u32 4294901760, %v31_v7  ;;  %v1082_v11 = vand.u32 4294901760, %v30_v8  ;;  %v1084_v12 = vand.u32 4294901760, %v29_v9  ;;  %v28_v13 = vld [vmem:[%s1476_s2 + $0x48] sm:$0xff]  ;;  %v27_v14 = vld [vmem:[%s1476_s2 + $0x40] sm:$0xff]  ;;  %v26_v19 = vld [vmem:[%s1476_s2 + $0x38] sm:$0xff] }
   0x4   :  { %797 = vmatpush3.msra.mxu0 %v1064_v4  ;;  %v1098_v15 = vsub.f32 %v34_v0, %v1064_v4  ;;  %v1101_v16 = vsub.f32 %v33_v1, %v1066_v5  ;;  %v1103_v17 = vand.u32 4294901760, %v28_v13  ;;  %v1106_v18 = vsub.f32 %v32_v2, %v1068_v6  ;;  %v25_v26 = vld [vmem:[%s1476_s2 + $0x30] sm:$0xff]  ;;  %v24_v34 = vld [vmem:[%s1476_s2 + $0x28] sm:$0xff] }
   0x5   :  { %798 = vmatprep.subr.mxu0 %v1031_v3  ;;  %v1113_v20 = vsub.f32 %v31_v7, %v1080_v10  ;;  %v1116_v21 = vsub.f32 %v30_v8, %v1082_v11  ;;  %v1122_v25 = vand.u32 4294901760, %v27_v14  ;;  %v1129_v28 = vand.u32 4294901760, %v26_v19 }
   0x6   :  { %799 = vmatpush3.msra.mxu0 %v1066_v5  ;;  %v129_v22 = vand.u32 4294901760, %v1098_v15  ;;  %v136_v23 = vand.u32 4294901760, %v1101_v16  ;;  %v143_v24 = vand.u32 4294901760, %v1106_v18  ;;  %v1133_v30 = vsub.f32 %v29_v9, %v1084_v12 }
   0x7   :  { %800 = vmatprep.subr.mxu0 %v1031_v3  ;;  %v150_v27 = vand.u32 4294901760, %v1113_v20  ;;  %v157_v29 = vand.u32 4294901760, %v1116_v21  ;;  %v1149_v35 = vsub.f32 %v28_v13, %v1103_v17 }
   0x8   :  { %801 = vmatpush3.msra.mxu0 %v1068_v6  ;;  %v130_v31 = vsub.f32 %v1098_v15, %v129_v22  ;;  %v137_v32 = vsub.f32 %v1101_v16, %v136_v23  ;;  %v144_v33 = vsub.f32 %v1106_v18, %v143_v24 }
   0x9   :  { %9 = vsyncpa [#allocation4], 0  ;;  %802 = vmatprep.subr.mxu0 %v1031_v3  ;;  %v1152_v36 = vand.u32 4294901760, %v25_v26  ;;  %v151_v39 = vsub.f32 %v1113_v20, %v150_v27  ;;  %v164_v40 = vand.u32 4294901760, %v1133_v30  ;;  %v23_v41 = vld [vmem:[%s1476_s2 + $0x20] sm:$0xff]  ;;  %v1163_v42 = vand.u32 4294901760, %v24_v34 }
   0xa   :  { %803 = vmatpush3.msra.mxu0 %v1080_v10  ;;  %v131_v37 = vand.u32 4294901760, %v130_v31  ;;  %v138_v38 = vand.u32 4294901760, %v137_v32  ;;  %v1166_v43 = vsub.f32 %v27_v14, %v1122_v25  ;;  %v145_v44 = vand.u32 4294901760, %v144_v33  ;;  %v16_v48 = vld [vmem:[%s1475_s1] sm:$0x1]  ;;  %v22_v50 = vld [vmem:[%s1476_s2 + $0x18] sm:$0xff] }
   0xb   :  { %804 = vmatprep.subr.mxu0 %v1031_v3  ;;  %v158_v45 = vsub.f32 %v1116_v21, %v157_v29  ;;  %v171_v46 = vand.u32 4294901760, %v1149_v35  ;;  %v1174_v47 = vsub.f32 %v26_v19, %v1129_v28  ;;  %v1181_v49 = vand.u32 4294901760, %v23_v41  ;;  %v21_v54 = vld [vmem:[%s1476_s2 + $0x10] sm:$0xff]  ;;  %v20_v61 = vld [vmem:[%s1476_s2 + $0x8] sm:$0xff]  ;;  %v19_v8 = vld [vmem:[%s1476_s2] sm:$0xff]  ;;  %s1033_s19 = smov [#allocation3]  }
   0xc   :  { %805 = vmatpush3.msra.mxu0 %v1082_v11  ;;  %832 = vmatpush3.msra.mxu1 %v131_v37  ;;  %v152_v51 = vand.u32 4294901760, %v151_v39  ;;  %v165_v52 = vsub.f32 %v1133_v30, %v164_v40  ;;  %v178_v53 = vand.u32 4294901760, %v1166_v43  ;;  %v1195_v55 = vsub.f32 %v25_v26, %v1152_v36  ;;  %s686_s20 = sshll.u32 %s1033_s19, 4  ;;  %s687_s20 = int_to_ptr.vmem [resolvable:$true] %s686_s20 }
   0xd   :  { %806 = vmatprep.subr.mxu0 %v1031_v3  ;;  %833 = vmatprep.subr.mxu1 %v1031_v3  ;;  %v185_v56 = vand.u32 4294901760, %v1174_v47  ;;  %v17_v57 = vmul.f32 %v16_v48, %v16_v48  ;;  %v159_v58 = vand.u32 4294901760, %v158_v45  ;;  %v172_v59 = vsub.f32 %v1149_v35, %v171_v46  ;;  %s1009_s21 = scalar_lea.vmem %s687_s20, 16  ;;  %s1013_s22 = scalar_lea.vmem %s687_s20, 32 }
   0xe   :  { %807 = vmatpush3.msra.mxu0 %v1084_v12  ;;  %834 = vmatpush3.msra.mxu1 %v138_v38  ;;  %v1204_v60 = vand.u32 4294901760, %v22_v50  ;;  %v1210_v62 = vsub.f32 %v24_v34, %v1163_v42  ;;  %v1214_v63 = vand.u32 4294901760, %v21_v54  ;;  %v166_v1 = vand.u32 4294901760, %v165_v52  ;;  %p1010_p0 = scmp.ne.s32.totalorder %s687_s20, %s1009_s21  ;;  %p1014_p1 = scmp.lt.s32.totalorder %s687_s20, %s687_s20 }
   0xf   :  { %808 = vmatprep.subr.mxu0 %v1031_v3  ;;  %835 = vmatprep.subr.mxu1 %v1031_v3  ;;  %v1216_v0 = vand.u32 4294901760, %v17_v57  ;;  %v179_v2 = vsub.f32 %v1166_v43, %v178_v53  ;;  %v192_v7 = vand.u32 4294901760, %v1195_v55  ;;  %v1227_v9 = vsub.f32 %v23_v41, %v1181_v49  ;;  %p1015_p2 = scmp.lt.s32.totalorder %s1013_s22, %s1009_s21 }
  0x10   :  { %809 = vmatpush3.msra.mxu0 %v1103_v17  ;;  %836 = vmatpush3.msra.mxu1 %v145_v44  ;;  %v186_v13 = vsub.f32 %v1174_v47, %v185_v56  ;;  %v1234_v14 = vand.u32 4294901760, %v20_v61  ;;  %v173_v19 = vand.u32 4294901760, %v172_v59  ;;  %v199_v26 = vand.u32 4294901760, %v1210_v62 }
  0x11   :  { %810 = vmatprep.subr.mxu0 %v1031_v3  ;;  %837 = vmatprep.subr.mxu1 %v1031_v3  ;;  %v1239_v31 = vsub.f32 %v17_v57, %v1216_v0  ;;  %v1242_v32 = vsub.f32 %v22_v50, %v1204_v60  ;;  %v1246_v33 = vand.u32 4294901760, %v19_v8  ;;  %v180_v34 = vand.u32 4294901760, %v179_v2  ;;  %p1016_p3 = por %p1015_p2, %p1014_p1 }
  0x12   :  { %811 = vmatpush3.msra.mxu0 %v1122_v25  ;;  %838 = vmatpush3.msra.mxu1 %v152_v51  ;;  %v193_v37 = vsub.f32 %v1195_v55, %v192_v7  ;;  %v206_v38 = vand.u32 4294901760, %v1227_v9  ;;  %v1254_v39 = vsub.f32 %v21_v54, %v1214_v63  ;;  %v187_v41 = vand.u32 4294901760, %v186_v13 }
  0x13   :  { %812 = vmatprep.subr.mxu0 %v1031_v3  ;;  %839 = vmatprep.subr.mxu1 %v1031_v3  ;;  %v200_v44 = vsub.f32 %v1210_v62, %v199_v26  ;;  %v118_v45 = vand.u32 4294901760, %v1239_v31  ;;  %v213_v48 = vand.u32 4294901760, %v1242_v32  ;;  %v1265_v50 = vsub.f32 %v20_v61, %v1234_v14  ;;  %p1017_p4 = pnand %p1016_p3, %p1010_p0 }
  0x14   :  { %813 = vmatpush3.msra.mxu0 %v1129_v28  ;;  %840 = vmatpush3.msra.mxu1 %v159_v58  ;;  %v194_v51 = vand.u32 4294901760, %v193_v37  ;;  %v207_v52 = vsub.f32 %v1227_v9, %v206_v38  ;;  %v220_v54 = vand.u32 4294901760, %v1254_v39  ;;  %v1275_v57 = vsub.f32 %v19_v8, %v1246_v33 }
  0x15   :  { %814 = vmatprep.subr.mxu0 %v1031_v3  ;;  %841 = vmatprep.subr.mxu1 %v1031_v3  ;;  %v201_v58 = vand.u32 4294901760, %v200_v44  ;;  %v119_v59 = vsub.f32 %v1239_v31, %v118_v45  ;;  %v214_v61 = vsub.f32 %v1242_v32, %v213_v48  ;;  %vm678_vm1 = vcmask 253952  }
  0x16   :  { %815 = vmatpush3.msra.mxu0 %v1152_v36  ;;  %842 = vmatpush3.msra.mxu1 %v166_v1  ;;  %v227_v1 = vand.u32 4294901760, %v1265_v50  ;;  %v208_v2 = vand.u32 4294901760, %v207_v52  ;;  %v221_v8 = vsub.f32 %v1254_v39, %v220_v54  ;;  %v234_v13 = vand.u32 4294901760, %v1275_v57 }
  0x17   :  { %816 = vmatprep.subr.mxu0 %v1031_v3  ;;  %843 = vmatprep.subr.mxu1 %v1031_v3 }
  0x18   :  { %817 = vmatpush3.msra.mxu0 %v1163_v42  ;;  %844 = vmatpush3.msra.mxu1 %v173_v19  ;;  %v120_v19 = vand.u32 4294901760, %v119_v59  ;;  %v228_v37 = vsub.f32 %v1265_v50, %v227_v1  ;;  %v235_v44 = vsub.f32 %v1275_v57, %v234_v13 }
  0x19   :  { %818 = vmatprep.subr.mxu0 %v1031_v3  ;;  %845 = vmatprep.subr.mxu1 %v1031_v3 }
  0x1a   :  { %819 = vmatpush3.msra.mxu0 %v1181_v49  ;;  %846 = vmatpush3.msra.mxu1 %v180_v34  ;;  %v215_v34 = vand.u32 4294901760, %v214_v61  ;;  %v236_v52 = vand.u32 4294901760, %v235_v44 }
  0x1b   :  { %820 = vmatprep.subr.mxu0 %v1031_v3  ;;  %847 = vmatprep.subr.mxu1 %v1031_v3 }
  0x1c   :  { %821 = vmatpush3.msra.mxu0 %v1204_v60  ;;  %848 = vmatpush3.msra.mxu1 %v187_v41  ;;  %v222_v41 = vand.u32 4294901760, %v221_v8 }
  0x1d   :  { %822 = vmatprep.subr.mxu0 %v1031_v3  ;;  %849 = vmatprep.subr.mxu1 %v1031_v3 }
  0x1e   :  { %823 = vmatpush3.msra.mxu0 %v1214_v63  ;;  %850 = vmatpush3.msra.mxu1 %v194_v51  ;;  %v229_v51 = vand.u32 4294901760, %v228_v37 }
  0x1f   :  { %824 = vmatprep.subr.mxu0 %v1031_v3  ;;  %851 = vmatprep.subr.mxu1 %v1031_v3 }
  0x20   :  { %825 = vmatpush3.msra.mxu0 %v1234_v14  ;;  %852 = vmatpush3.msra.mxu1 %v201_v58 }
  0x21   :  { %826 = vmatprep.subr.mxu0 %v1031_v3  ;;  %853 = vmatprep.subr.mxu1 %v1031_v3 }
  0x22   :  { %827 = vmatpush3.msra.mxu0 %v1246_v33  ;;  %854 = vmatpush3.msra.mxu1 %v208_v2 }
  0x23   :  { %855 = vmatprep.subr.mxu1 %v1031_v3  ;;  %866 = vmatprep.subr.mxu0 %v1031_v3 }
  0x24   :  { %829 = vmatmul.mubr.f32.vlgmr.msra.gmra.mxu0 %v120_v19  ;;  %856 = vmatpush3.msra.mxu1 %v215_v34 }
  0x25   :  { %867 = vmatpush3.msra.mxu0 %v1098_v15  ;;  %857 = vmatprep.subr.mxu1 %v1031_v3 }
  0x26   :  { %868 = vmatprep.subr.mxu0 %v1031_v3  ;;  %858 = vmatpush3.msra.mxu1 %v222_v41 }
  0x27   :  { %869 = vmatpush3.msra.mxu0 %v1101_v16  ;;  %859 = vmatprep.subr.mxu1 %v1031_v3 }
  0x28   :  { %870 = vmatprep.subr.mxu0 %v1031_v3  ;;  %860 = vmatpush3.msra.mxu1 %v229_v51 }
  0x29   :  { %871 = vmatpush3.msra.mxu0 %v1106_v18  ;;  %861 = vmatprep.subr.mxu1 %v1031_v3 }
  0x2a   :  { %872 = vmatprep.subr.mxu0 %v1031_v3  ;;  %862 = vmatpush3.msra.mxu1 %v236_v52 }
  0x2b   :  { %873 = vmatpush3.msra.mxu0 %v1113_v20  ;;  %864 = vmatmul.mubr.f32.vlgmr.msra.gmra.mxu1 %v1216_v0 }
  0x2c   :  { %874 = vmatprep.subr.mxu0 %v1031_v3  ;;  %901 = vmatprep.subr.mxu1 %v1031_v3 }
  0x2d   :  { %875 = vmatpush3.msra.mxu0 %v1116_v21  ;;  %902 = vmatpush3.msra.mxu1 %v1064_v4 }
  0x2e   :  { %876 = vmatprep.subr.mxu0 %v1031_v3  ;;  %903 = vmatprep.subr.mxu1 %v1031_v3 }
  0x2f   :  { %877 = vmatpush3.msra.mxu0 %v1133_v30  ;;  %904 = vmatpush3.msra.mxu1 %v1066_v5 }
  0x30   :  { %878 = vmatprep.subr.mxu0 %v1031_v3  ;;  %905 = vmatprep.subr.mxu1 %v1031_v3 }
  0x31   :  { %879 = vmatpush3.msra.mxu0 %v1149_v35  ;;  %906 = vmatpush3.msra.mxu1 %v1068_v6 }
  0x32   :  { %880 = vmatprep.subr.mxu0 %v1031_v3  ;;  %907 = vmatprep.subr.mxu1 %v1031_v3 }
  0x33   :  { %881 = vmatpush3.msra.mxu0 %v1166_v43  ;;  %908 = vmatpush3.msra.mxu1 %v1080_v10 }
  0x34   :  { %882 = vmatprep.subr.mxu0 %v1031_v3  ;;  %909 = vmatprep.subr.mxu1 %v1031_v3 }
  0x35   :  { %883 = vmatpush3.msra.mxu0 %v1174_v47  ;;  %910 = vmatpush3.msra.mxu1 %v1082_v11 }
  0x36   :  { %884 = vmatprep.subr.mxu0 %v1031_v3  ;;  %911 = vmatprep.subr.mxu1 %v1031_v3 }
  0x37   :  { %885 = vmatpush3.msra.mxu0 %v1195_v55  ;;  %912 = vmatpush3.msra.mxu1 %v1084_v12 }
  0x38   :  { %886 = vmatprep.subr.mxu0 %v1031_v3  ;;  %913 = vmatprep.subr.mxu1 %v1031_v3 }
  0x39   :  { %887 = vmatpush3.msra.mxu0 %v1210_v62  ;;  %914 = vmatpush3.msra.mxu1 %v1103_v17 }
  0x3a   :  { %888 = vmatprep.subr.mxu0 %v1031_v3  ;;  %915 = vmatprep.subr.mxu1 %v1031_v3 }
  0x3b   :  { %889 = vmatpush3.msra.mxu0 %v1227_v9  ;;  %916 = vmatpush3.msra.mxu1 %v1122_v25 }
  0x3c   :  { %890 = vmatprep.subr.mxu0 %v1031_v3  ;;  %917 = vmatprep.subr.mxu1 %v1031_v3 }
  0x3d   :  { %891 = vmatpush3.msra.mxu0 %v1242_v32  ;;  %918 = vmatpush3.msra.mxu1 %v1129_v28 }
  0x3e   :  { %892 = vmatprep.subr.mxu0 %v1031_v3  ;;  %919 = vmatprep.subr.mxu1 %v1031_v3 }
  0x3f   :  { %893 = vmatpush3.msra.mxu0 %v1254_v39  ;;  %920 = vmatpush3.msra.mxu1 %v1152_v36 }
  0x40   :  { %894 = vmatprep.subr.mxu0 %v1031_v3  ;;  %921 = vmatprep.subr.mxu1 %v1031_v3 }
  0x41   :  { %895 = vmatpush3.msra.mxu0 %v1265_v50  ;;  %922 = vmatpush3.msra.mxu1 %v1163_v42 }
  0x42   :  { %896 = vmatprep.subr.mxu0 %v1031_v3  ;;  %923 = vmatprep.subr.mxu1 %v1031_v3 }
  0x43   :  { %897 = vmatpush3.msra.mxu0 %v1275_v57  ;;  %898 = vmatprep.mubr.msk.f32.mxu0 %vm1032_vm0, %v1031_v3 }
  0x44   :  { %924 = vmatpush3.msra.mxu1 %v1181_v49  ;;  %899 = vmatmul.mubr.f32.vlgmr.msra.gmra.mxu0 %v1239_v31 }
  0x45   :  { %925 = vmatprep.subr.mxu1 %v1031_v3  ;;  %936 = vmatprep.subr.mxu0 %v1031_v3 }
  0x46   :  { %926 = vmatpush3.msra.mxu1 %v1204_v60  ;;  %937 = vmatpush3.msra.mxu0 %v129_v22 }
  0x47   :  { %927 = vmatprep.subr.mxu1 %v1031_v3  ;;  %938 = vmatprep.subr.mxu0 %v1031_v3 }
  0x48   :  { %928 = vmatpush3.msra.mxu1 %v1214_v63  ;;  %939 = vmatpush3.msra.mxu0 %v136_v23 }
  0x49   :  { %929 = vmatprep.subr.mxu1 %v1031_v3  ;;  %940 = vmatprep.subr.mxu0 %v1031_v3 }
  0x4a   :  { %930 = vmatpush3.msra.mxu1 %v1234_v14  ;;  %941 = vmatpush3.msra.mxu0 %v143_v24 }
  0x4b   :  { %931 = vmatprep.subr.mxu1 %v1031_v3  ;;  %942 = vmatprep.subr.mxu0 %v1031_v3 }
  0x4c   :  { %932 = vmatpush3.msra.mxu1 %v1246_v33  ;;  %933 = vmatprep.mubr.msk.f32.mxu1 %vm1032_vm0, %v1031_v3 }
  0x4d   :  { %943 = vmatpush3.msra.mxu0 %v150_v27  ;;  %934 = vmatmul.mubr.f32.vlgmr.msra.gmra.mxu1 %v118_v45 }
  0x4e   :  { %944 = vmatprep.subr.mxu0 %v1031_v3  ;;  %971 = vmatprep.subr.mxu1 %v1031_v3 }
  0x4f   :  { %945 = vmatpush3.msra.mxu0 %v157_v29  ;;  %972 = vmatpush3.msra.mxu1 %v1064_v4 }
  0x50   :  { %946 = vmatprep.subr.mxu0 %v1031_v3  ;;  %973 = vmatprep.subr.mxu1 %v1031_v3 }
  0x51   :  { %947 = vmatpush3.msra.mxu0 %v164_v40  ;;  %974 = vmatpush3.msra.mxu1 %v1066_v5 }
  0x52   :  { %948 = vmatprep.subr.mxu0 %v1031_v3  ;;  %975 = vmatprep.subr.mxu1 %v1031_v3 }
  0x53   :  { %949 = vmatpush3.msra.mxu0 %v171_v46  ;;  %976 = vmatpush3.msra.mxu1 %v1068_v6 }
  0x54   :  { %950 = vmatprep.subr.mxu0 %v1031_v3  ;;  %977 = vmatprep.subr.mxu1 %v1031_v3 }
  0x55   :  { %951 = vmatpush3.msra.mxu0 %v178_v53  ;;  %978 = vmatpush3.msra.mxu1 %v1080_v10 }
  0x56   :  { %952 = vmatprep.subr.mxu0 %v1031_v3  ;;  %979 = vmatprep.subr.mxu1 %v1031_v3 }
  0x57   :  { %953 = vmatpush3.msra.mxu0 %v185_v56  ;;  %980 = vmatpush3.msra.mxu1 %v1082_v11 }
  0x58   :  { %954 = vmatprep.subr.mxu0 %v1031_v3  ;;  %981 = vmatprep.subr.mxu1 %v1031_v3 }
  0x59   :  { %955 = vmatpush3.msra.mxu0 %v192_v7  ;;  %982 = vmatpush3.msra.mxu1 %v1084_v12 }
  0x5a   :  { %956 = vmatprep.subr.mxu0 %v1031_v3  ;;  %983 = vmatprep.subr.mxu1 %v1031_v3 }
  0x5b   :  { %957 = vmatpush3.msra.mxu0 %v199_v26  ;;  %984 = vmatpush3.msra.mxu1 %v1103_v17 }
  0x5c   :  { %958 = vmatprep.subr.mxu0 %v1031_v3  ;;  %985 = vmatprep.subr.mxu1 %v1031_v3 }
  0x5d   :  { %959 = vmatpush3.msra.mxu0 %v206_v38  ;;  %986 = vmatpush3.msra.mxu1 %v1122_v25 }
  0x5e   :  { %960 = vmatprep.subr.mxu0 %v1031_v3  ;;  %987 = vmatprep.subr.mxu1 %v1031_v3 }
  0x5f   :  { %961 = vmatpush3.msra.mxu0 %v213_v48  ;;  %988 = vmatpush3.msra.mxu1 %v1129_v28 }
  0x60   :  { %962 = vmatprep.subr.mxu0 %v1031_v3  ;;  %989 = vmatprep.subr.mxu1 %v1031_v3 }
  0x61   :  { %963 = vmatpush3.msra.mxu0 %v220_v54  ;;  %990 = vmatpush3.msra.mxu1 %v1152_v36 }
  0x62   :  { %964 = vmatprep.subr.mxu0 %v1031_v3  ;;  %991 = vmatprep.subr.mxu1 %v1031_v3 }
  0x63   :  { %965 = vmatpush3.msra.mxu0 %v227_v1  ;;  %992 = vmatpush3.msra.mxu1 %v1163_v42 }
  0x64   :  { %966 = vmatprep.subr.mxu0 %v1031_v3  ;;  %993 = vmatprep.subr.mxu1 %v1031_v3 }
  0x65   :  { %967 = vmatpush3.msra.mxu0 %v234_v13  ;;  %968 = vmatprep.mubr.msk.f32.mxu0 %vm1032_vm0, %v1031_v3 }
  0x66   :  { %994 = vmatpush3.msra.mxu1 %v1181_v49  ;;  %969 = vmatmul.mubr.f32.vlgmr.msra.gmra.mxu0 %v1216_v0 }
  0x67   :  { %995 = vmatprep.subr.mxu1 %v1031_v3  ;;  %1003 = vmatprep.mubr.msk.f32.mxu1 %vm1032_vm0, %v1031_v3 }
  0x68   :  { %996 = vmatpush3.msra.mxu1 %v1204_v60 }
  0x69   :  { %997 = vmatprep.subr.mxu1 %v1031_v3 }
  0x6a   :  { %998 = vmatpush3.msra.mxu1 %v1214_v63 }
  0x6b   :  { %999 = vmatprep.subr.mxu1 %v1031_v3 }
  0x6c   :  { %1000 = vmatpush3.msra.mxu1 %v1234_v14 }
  0x6d   :  { %1001 = vmatprep.subr.mxu1 %v1031_v3  ;;  %v676_v3 = vstv %s1474_s0 }
  0x6e   :  { %1002 = vmatpush3.msra.mxu1 %v1246_v33 }
  0x6f   :  { %1004 = vmatmul.mubr.f32.vlgmr.msra.gmra.mxu1 %v1216_v0 }
  0xe4   :  { %v122_v4 = vpop.f32.mrf.mxu0 }
  0xe6   :  { %v830_v5 = vpop.f32.mrf.mxu0 }
  0xeb   :  { %v273_v6 = vpop.f32.mrf.mxu1 }
  0xec   :  { %v274_v18 = vadd.f32 %v273_v6, %v122_v4 }
  0xed   :  { %v865_v10 = vpop.f32.mrf.mxu1 }
 0x104   :  { %v377_v11 = vpop.f32.mrf.mxu0 }
 0x105   :  { %v378_v21 = vadd.f32 %v377_v11, %v274_v18 }
 0x106   :  { %v900_v12 = vpop.f32.mrf.mxu0 }
 0x10d   :  { %v466_v15 = vpop.f32.mrf.mxu1 }
 0x10e   :  { %v467_v22 = vadd.f32 %v466_v15, %v378_v21 }
 0x10f   :  { %v935_v16 = vpop.f32.mrf.mxu1 }
 0x126   :  { %v585_v17 = vpop.f32.mrf.mxu0 }
 0x127   :  { %v586_v23 = vadd.f32 %v585_v17, %v467_v22 }
 0x128   :  { %v970_v20 = vpop.f32.mrf.mxu0 }
 0x12f   :  { %v672_v24 = vpop.f32.mrf.mxu1 }
 0x130   :  { %v673_v25 = vadd.f32 %v672_v24, %v586_v23 }
 0x131   :  { %v1005_v27 = vpop.f32.mrf.mxu1 }
 0x132   :  { %v677_v28 = vsub.f32 %v676_v3, %v673_v25 }
 0x134   :  { %679 = vst.msk [vmem:[#allocation3] sm:$0x1] %vm678_vm1, %v677_v28 }
 0x135   :  { %1020 = shalt.err (!%p1017_p4)
}
 0x136   :  { %689 = dma.vmem_to_hbm [thread:$0]  %s687_s20, 16, %s1477_s3, [#allocation4]  }
 0x137   :  { %1029 = dma.done.wait [#allocation4], 16  }
 0x138   :  { %1030 = vsyncadd [#allocation4], 4294967280 }
 0x139   :  { %693 = vsyncpa [#allocation4], 1 }

</bundles_post_ra>
